<compile_context>
chip_gen: v6e
topology: v6e:2x2x1
jax: 0.10.0
libtpu: 0.0.40
codegen_flags: <defaults>
</compile_context>

<pallas_src>
import jax
import jax.numpy as jnp
from jax.experimental import pallas as pl
from jax.experimental.pallas import tpu as pltpu


LANE = 128          # lane width
SUBLANE_BF16 = 16   # bf16 sublane packing granularity


def _round_up(n: int, m: int) -> int:
    return ((n + m - 1) // m) * m


# ----------------------------------------------------------------------------
# Pallas kernel: fused  dropout(eval)=identity -> fc0 -> relu -> fc1
# ----------------------------------------------------------------------------
def mlp_head_kernel(x_ref, w0_ref, b0_ref, w1_ref, b1_ref, o_ref):
    # x_ref : [TB, E] bf16   w0_ref: [E, H]  bf16   b0_ref: [1, H]  f32
    # w1_ref: [H, Op] bf16   b1_ref: [1, Op] f32    o_ref : [TB, Op] f32
    # bf16 operands go straight to the MXU; accumulate in f32.
    h = jnp.dot(x_ref[...], w0_ref[...], preferred_element_type=jnp.float32)
    h = jnp.maximum(h + b0_ref[...], 0.0)          # bias + relu in f32 (VPU)
    h = h.astype(jnp.bfloat16)                     # bf16 again for 2nd MXU pass
    o = jnp.dot(h, w1_ref[...], preferred_element_type=jnp.float32)
    o_ref[...] = o + b1_ref[...]                   # f32, lane-dense store


def net_head(x, w0, b0, w1, b1, *, block_b: int = 512):
    """x: [B, E] float32 CLS embeddings -> logits [B, output_dim] float32."""
    B, E = x.shape
    H = w0.shape[1]
    O = w1.shape[1]

    # --- lane-dense output: zero-pad O up to a multiple of 128 --------------
    O_pad = _round_up(max(O, LANE), LANE)
    w1_p = jnp.zeros((H, O_pad), jnp.float32).at[:, :O].set(
        w1.astype(jnp.float32))
    b1_p = jnp.zeros((1, O_pad), jnp.float32).at[0, :O].set(
        b1.astype(jnp.float32))
    b0_2d = b0.astype(jnp.float32).reshape(1, H)

    # --- batch tiling: multiple of 16 (bf16 sublanes), capped at block_b ----
    TB = min(_round_up(block_b, SUBLANE_BF16), _round_up(B, SUBLANE_BF16))
    B_pad = _round_up(B, TB)
    x_p = jnp.zeros((B_pad, E), jnp.bfloat16).at[:B, :].set(
        x.astype(jnp.bfloat16))

    # bf16 MXU operands (production code would keep weights stored in bf16 so
    # these casts are not re-done per call).
    w0_bf = w0.astype(jnp.bfloat16)
    w1_bf = w1_p.astype(jnp.bfloat16)

    grid = (B_pad // TB,)
    out = pl.pallas_call(
        mlp_head_kernel,
        out_shape=jax.ShapeDtypeStruct((B_pad, O_pad), jnp.float32),
        grid=grid,
        in_specs=[
            pl.BlockSpec((TB, E), lambda i: (i, 0)),      # x tile (pipelined)
            pl.BlockSpec((E, H), lambda i: (0, 0)),       # w0 VMEM-resident
            pl.BlockSpec((1, H), lambda i: (0, 0)),       # b0 VMEM-resident
            pl.BlockSpec((H, O_pad), lambda i: (0, 0)),   # w1 VMEM-resident
            pl.BlockSpec((1, O_pad), lambda i: (0, 0)),   # b1 VMEM-resident
        ],
        out_specs=pl.BlockSpec((TB, O_pad), lambda i: (i, 0)),
        compiler_params=pltpu.CompilerParams(
            dimension_semantics=("parallel",)),           # batch over both TCs
    )(x_p, w0_bf, b0_2d, w1_bf, b1_p)

    return out[:B, :O]


# ----------------------------------------------------------------------------
# Full forward (glue in plain JAX + Pallas head)
# ----------------------------------------------------------------------------
def net_forward(params, input_ids, attention_mask, output_dim):
    # TODO(synk): the HuggingFace AutoModel transformer backbone is not
    # translated; a deterministic embedding-lookup + attention-masked mean
    # pool stands in for `self.embedding(...)[0][:, 0]`.
    tok = params["embed_table"][input_ids]                       # [B, S, E]
    mask = attention_mask.astype(jnp.float32)[..., None]         # [B, S, 1]
    x = (tok * mask).sum(axis=1) / jnp.maximum(mask.sum(axis=1), 1.0)  # [B, E]

    # dropout (eval mode) = identity
    logits = net_head(x, params["w0"], params["b0"],
                      params["w1"], params["b1"])                # [B, O]

    # Mirror the original module: squeeze(-1) only in the output_dim != 1
    # branch (torch.squeeze is a no-op when that dim is not size 1).
    if output_dim != 1 and logits.shape[-1] == 1:
        logits = jnp.squeeze(logits, axis=-1)
    return logits


def init_params(key, vocab_size, embedding_dim, hidden_dim, output_dim):
    k0, k1, k2 = jax.random.split(key, 3)
    # matches Net.reset_parameters(): normal(0, 0.02) weights, zero biases
    return {
        "embed_table": jax.random.normal(k0, (vocab_size, embedding_dim),
                                         jnp.float32) * 0.02,
        "w0": jax.random.normal(k1, (embedding_dim, hidden_dim),
                                jnp.float32) * 0.02,
        "b0": jnp.zeros((hidden_dim,), jnp.float32),
        "w1": jax.random.normal(k2, (hidden_dim, output_dim),
                                jnp.float32) * 0.02,
        "b1": jnp.zeros((output_dim,), jnp.float32),
    }


if __name__ == "__main__":
    # small shapes consistent with the module
    B, S = 2, 8               # batch, sequence length
    VOCAB = 64
    E = 128                   # embedding (transformer hidden_size) stand-in
    HIDDEN = 256              # hidden_dim in Net.__init__
    OUTPUT_DIM = 4

    key = jax.random.PRNGKey(0)
    kp, ki = jax.random.split(key)
    params = init_params(kp, VOCAB, E, HIDDEN, OUTPUT_DIM)

    input_ids = jax.random.randint(ki, (B, S), 0, VOCAB, dtype=jnp.int32)
    attention_mask = jnp.ones((B, S), dtype=jnp.int32)

    logits = net_forward(params, input_ids, attention_mask, OUTPUT_DIM)
    logits = jax.block_until_ready(logits)

    # reference: same bf16-operand / f32-accumulate math path in plain JAX
    tok = params["embed_table"][input_ids]
    mask = attention_mask.astype(jnp.float32)[..., None]
    x_cls = (tok * mask).sum(axis=1) / jnp.maximum(mask.sum(axis=1), 1.0)
    xb = x_cls.astype(jnp.bfloat16)
    w0b = params["w0"].astype(jnp.bfloat16)
    w1b = params["w1"].astype(jnp.bfloat16)
    h_ref = jnp.maximum(
        jnp.dot(xb, w0b, preferred_element_type=jnp.float32) + params["b0"],
        0.0)
    ref = (jnp.dot(h_ref.astype(jnp.bfloat16), w1b,
                   preferred_element_type=jnp.float32) + params["b1"])

    assert logits.shape == (B, OUTPUT_DIM), logits.shape
    assert jnp.allclose(logits, ref, atol=2e-5, rtol=1e-3), (
        float(jnp.max(jnp.abs(logits - ref))))

    print("KERNEL_OK")
</pallas_src>

<mosaic_0001>
module attributes {stable_mosaic.version = 11 : i64} {
  func.func @mlp_head_kernel(%arg0: i32, %arg1: memref<16x128xbf16, #tpu.memory_space<vmem>>, %arg2: memref<128x256xbf16, #tpu.memory_space<vmem>>, %arg3: memref<1x256xf32, #tpu.memory_space<vmem>>, %arg4: memref<256x128xbf16, #tpu.memory_space<vmem>>, %arg5: memref<1x128xf32, #tpu.memory_space<vmem>>, %arg6: memref<16x128xf32, #tpu.memory_space<vmem>>) attributes {dimension_semantics = [#tpu.dimension_semantics<parallel>], iteration_bounds = array<i64: 1>, scalar_prefetch = 0 : i64, scratch_operands = 0 : i64, tpu.core_type = #tpu.core_type<tc>, window_params = [{transform_indices = @transform_0, window_bounds = array<i64: 16, 128>}, {pipeline_mode = #tpu.pipeline_mode<synchronous>, transform_indices = @transform_1, window_bounds = array<i64: 128, 256>}, {pipeline_mode = #tpu.pipeline_mode<synchronous>, transform_indices = @transform_2, window_bounds = array<i64: 1, 256>}, {pipeline_mode = #tpu.pipeline_mode<synchronous>, transform_indices = @transform_3, window_bounds = array<i64: 256, 128>}, {pipeline_mode = #tpu.pipeline_mode<synchronous>, transform_indices = @transform_4, window_bounds = array<i64: 1, 128>}, {transform_indices = @transform_5, window_bounds = array<i64: 16, 128>}]} {
    %c0 = arith.constant 0 : index
    %c0_0 = arith.constant 0 : index
    %0 = vector.load %arg1[%c0, %c0_0] : memref<16x128xbf16, #tpu.memory_space<vmem>>, vector<16x128xbf16>
    %c0_1 = arith.constant 0 : index
    %c0_2 = arith.constant 0 : index
    %1 = vector.load %arg2[%c0_1, %c0_2] : memref<128x256xbf16, #tpu.memory_space<vmem>>, vector<128x256xbf16>
    %cst = arith.constant dense<0.000000e+00> : vector<16x256xf32>
    %2 = tpu.matmul %0, %1, %cst {dimension_numbers = #tpu.dot_dimension_numbers<[1], [0], [0], [1], [0, 0, 1, 1], [], []>} : vector<16x128xbf16>, vector<128x256xbf16>, vector<16x256xf32> -> vector<16x256xf32>
    %c0_3 = arith.constant 0 : index
    %c0_4 = arith.constant 0 : index
    %3 = vector.load %arg3[%c0_3, %c0_4] : memref<1x256xf32, #tpu.memory_space<vmem>>, vector<1x256xf32>
    %4 = vector.broadcast %3 : vector<1x256xf32> to vector<16x256xf32>
    %5 = arith.addf %2, %4 : vector<16x256xf32>
    %cst_5 = arith.constant 0.000000e+00 : f32
    %6 = vector.broadcast %cst_5 : f32 to vector<16x256xf32>
    %7 = arith.maximumf %5, %6 : vector<16x256xf32>
    %8 = arith.truncf %7 : vector<16x256xf32> to vector<16x256xbf16>
    %c0_6 = arith.constant 0 : index
    %c0_7 = arith.constant 0 : index
    %9 = vector.load %arg4[%c0_6, %c0_7] : memref<256x128xbf16, #tpu.memory_space<vmem>>, vector<256x128xbf16>
    %cst_8 = arith.constant dense<0.000000e+00> : vector<16x128xf32>
    %10 = tpu.matmul %8, %9, %cst_8 {dimension_numbers = #tpu.dot_dimension_numbers<[1], [0], [0], [1], [0, 0, 1, 1], [], []>} : vector<16x256xbf16>, vector<256x128xbf16>, vector<16x128xf32> -> vector<16x128xf32>
    %c0_9 = arith.constant 0 : index
    %c0_10 = arith.constant 0 : index
    %11 = vector.load %arg5[%c0_9, %c0_10] : memref<1x128xf32, #tpu.memory_space<vmem>>, vector<1x128xf32>
    %12 = vector.broadcast %11 : vector<1x128xf32> to vector<16x128xf32>
    %13 = arith.addf %10, %12 : vector<16x128xf32>
    %c0_11 = arith.constant 0 : index
    %c0_12 = arith.constant 0 : index
    %14 = vector.load %arg6[%c0_11, %c0_12] : memref<16x128xf32, #tpu.memory_space<vmem>>, vector<16x128xf32>
    tpu.vector_store %arg6[%c0_11, %c0_12], %13 {strides = array<i32>} : memref<16x128xf32, #tpu.memory_space<vmem>>, vector<16x128xf32>,
    return
  }
  func.func @transform_0(%arg0: i32) -> (i32, i32) {
    %c0_i32 = arith.constant 0 : i32
    %c0_i32_0 = arith.constant 0 : i32
    return %arg0, %c0_i32 : i32, i32
  }
  func.func @transform_1(%arg0: i32) -> (i32, i32) {
    %c0_i32 = arith.constant 0 : i32
    %c0_i32_0 = arith.constant 0 : i32
    %c0_i32_1 = arith.constant 0 : i32
    return %c0_i32, %c0_i32_0 : i32, i32
  }
  func.func @transform_2(%arg0: i32) -> (i32, i32) {
    %c0_i32 = arith.constant 0 : i32
    %c0_i32_0 = arith.constant 0 : i32
    %c0_i32_1 = arith.constant 0 : i32
    return %c0_i32, %c0_i32_0 : i32, i32
  }
  func.func @transform_3(%arg0: i32) -> (i32, i32) {
    %c0_i32 = arith.constant 0 : i32
    %c0_i32_0 = arith.constant 0 : i32
    %c0_i32_1 = arith.constant 0 : i32
    return %c0_i32, %c0_i32_0 : i32, i32
  }
  func.func @transform_4(%arg0: i32) -> (i32, i32) {
    %c0_i32 = arith.constant 0 : i32
    %c0_i32_0 = arith.constant 0 : i32
    %c0_i32_1 = arith.constant 0 : i32
    return %c0_i32, %c0_i32_0 : i32, i32
  }
  func.func @transform_5(%arg0: i32) -> (i32, i32) {
    %c0_i32 = arith.constant 0 : i32
    %c0_i32_0 = arith.constant 0 : i32
    return %arg0, %c0_i32 : i32, i32
  }
}

</mosaic_0001>

<bundles_post_ra>
// kernel: tpu_custom_call.1
= control target key start
LH: loop header
LB: loop body
LE: loop exit
PB: predicated region body
PF: predicated region fallthrough
CT: control target
= control target key end

     0   :  { %10 = vsyncpa [#allocation3], 0  ;;  %s679_s0 = inlined_call_operand.hbm [shape: bf16[16,128], index: 0, kind: input, shape index: {}]   ;;  %s680_s1 = inlined_call_operand.hbm [shape: bf16[128,256], index: 1, kind: input, shape index: {}]   ;;  %s681_s2 = inlined_call_operand.vmem [shape: f32[1,256], index: 2, kind: input, shape index: {}]   ;;  %s682_s3 = inlined_call_operand.hbm [shape: bf16[256,128], index: 3, kind: input, shape index: {}]   ;;  %s683_s4 = inlined_call_operand.vmem [shape: f32[1,128], index: 4, kind: input, shape index: {}]   ;;  %s684_s5 = inlined_call_operand.hbm [shape: f32[16,128], index: 5, kind: output, shape index: {}]  }
   0x1   :  { %11 = vsyncpa [#allocation6], 0 }
   0x2   :  { %12 = vsyncpa [#allocation4], 0  ;;  %s616_s18 = smov [#allocation5]  }
   0x3   :  { %s30_s19 = sshll.u32 %s616_s18, 4  ;;  %s31_s19 = int_to_ptr.vmem [resolvable:$true] %s30_s19 }
   0x4   :  { %s538_s20 = scalar_lea.vmem %s31_s19, 2048  ;;  %p543_p1 = scmp.lt.s32.totalorder %s31_s19, %s31_s19 }
   0x5   :  { %p539_p0 = scmp.ne.s32.totalorder %s31_s19, %s538_s20  ;;  %p544_p2 = scmp.lt.s32.totalorder %s538_s20, %s538_s20 }
   0x7   :  { %p545_p3 = por %p544_p2, %p543_p1 }
   0x9   :  { %p546_p4 = pnand %p545_p3, %p539_p0 }
   0xb   :  { %549 = shalt.err (!%p546_p4)
}
   0xc   :  { %s617_s21 = smov 128   ;;  %s618_s22 = smov 8  }
   0xd   :  { %36 = dma.hbm_to_vmem [thread:$0]  %s680_s1, 2048, %s31_s19, [#allocation6], %s617_s21, %s617_s21, %s618_s22  }
   0xe   :  { %s619_s25 = smov [#allocation2]  }
   0xf   :  { %s18_s26 = sshll.u32 %s619_s25, 4  ;;  %s19_s26 = int_to_ptr.vmem [resolvable:$true] %s18_s26 }
  0x10   :  { %s558_s27 = scalar_lea.vmem %s19_s26, 128  ;;  %p563_p6 = scmp.lt.s32.totalorder %s19_s26, %s19_s26 }
  0x11   :  { %p559_p5 = scmp.ne.s32.totalorder %s19_s26, %s558_s27  ;;  %p564_p7 = scmp.lt.s32.totalorder %s558_s27, %s558_s27 }
  0x13   :  { %p565_p8 = por %p564_p7, %p563_p6 }
  0x15   :  { %p566_p9 = pnand %p565_p8, %p559_p5 }
  0x17   :  { %569 = shalt.err (!%p566_p9)
}
  0x18   :  { %s620_s28 = smov 64   ;;  %s621_s29 = smov 4  }
  0x19   :  { %24 = dma.hbm_to_vmem [thread:$0]  %s679_s0, 128, %s19_s26, [#allocation3], %s620_s28, %s620_s28, %s621_s29  }
  0x1a   :  { %s622_s7 = smov [#allocation7]  }
  0x1b   :  { %s44_s8 = sshll.u32 %s622_s7, 4  ;;  %s45_s8 = int_to_ptr.vmem [resolvable:$true] %s44_s8 }
  0x1c   :  { %s578_s1 = scalar_lea.vmem %s45_s8, 2048  ;;  %p583_p11 = scmp.lt.s32.totalorder %s45_s8, %s45_s8 }
  0x1d   :  { %p579_p10 = scmp.ne.s32.totalorder %s45_s8, %s578_s1  ;;  %p584_p12 = scmp.lt.s32.totalorder %s578_s1, %s578_s1 }
  0x1f   :  { %p585_p13 = por %p584_p12, %p583_p11 }
  0x21   :  { %p586_p0 = pnand %p585_p13, %p579_p10 }
  0x23   :  { %589 = shalt.err (!%p586_p0)
}
  0x24   :  { %50 = dma.hbm_to_vmem [thread:$0]  %s682_s3, 2048, %s45_s8, [#allocation6], %s620_s28, %s620_s28, %s621_s29  }
  0x25   :  { %610 = dma.done.wait [#allocation3], 128  }
  0x26   :  { %611 = vsyncadd [#allocation3], 4294967168 }
  0x27   :  { %612 = dma.done.wait [#allocation6], 4096  }
  0x28   :  { %613 = vsyncadd [#allocation6], 4294963200  ;;  %v623_v0 = vmov 0   ;;  %v489_v1 = vld [vmem:[#allocation5 + $0x74] ss:$8 sps:$4 sm:$0xff]   ;;  %v518_v16 = vld [vmem:[#allocation7 + $0x68] sm:$0xff]   ;;  %v83_v34 = vlaneseq }
  0x29   :  { %211 = vmatprep.mubr.bf16.mxu0 %v623_v0  ;;  %v491_v2 = vld [vmem:[#allocation5 + $0x70] ss:$8 sps:$4 sm:$0xff]   ;;  %179 = vmatprep.subr.bf16.mxu0 %v489_v1  ;;  %v492_v3 = vld [vmem:[#allocation5 + $0x64] ss:$8 sps:$4 sm:$0xff]   ;;  %v494_v4 = vld [vmem:[#allocation5 + $0x60] ss:$8 sps:$4 sm:$0xff]  }
  0x2a   :  { %180 = vmatpush1.bf16.msra.mxu0 %v491_v2  ;;  %v495_v5 = vld [vmem:[#allocation5 + $0x54] ss:$8 sps:$4 sm:$0xff]   ;;  %v497_v6 = vld [vmem:[#allocation5 + $0x50] ss:$8 sps:$4 sm:$0xff]   ;;  %v498_v7 = vld [vmem:[#allocation5 + $0x44] ss:$8 sps:$4 sm:$0xff]  }
  0x2b   :  { %181 = vmatprep.subr.bf16.mxu0 %v492_v3  ;;  %v500_v8 = vld [vmem:[#allocation5 + $0x40] ss:$8 sps:$4 sm:$0xff]   ;;  %v501_v9 = vld [vmem:[#allocation5 + $0x34] ss:$8 sps:$4 sm:$0xff]   ;;  %v503_v11 = vld [vmem:[#allocation5 + $0x30] ss:$8 sps:$4 sm:$0xff]  }
  0x2c   :  { %v514_v10 = vld [vmem:[#allocation7 + $0x78] sm:$0xff]   ;;  %v504_v13 = vld [vmem:[#allocation5 + $0x24] ss:$8 sps:$4 sm:$0xff]   ;;  %v516_v14 = vld [vmem:[#allocation7 + $0x70] sm:$0xff]   ;;  %v84_v35 = vshrl.u32 %v83_v34, 7  ;;  %s624_s12 = smov [#allocation8]  }
  0x2d   :  { %v515_v12 = vld [vmem:[#allocation7 + $0x38] sm:$0xff]   ;;  %458 = vmatprep.subr.bf16.mxu1 %v514_v10  ;;  %v517_v15 = vld [vmem:[#allocation7 + $0x30] sm:$0xff]   ;;  %v506_v17 = vld [vmem:[#allocation5 + $0x20] ss:$8 sps:$4 sm:$0xff]   ;;  %s411_s13 = sshll.u32 %s624_s12, 4  ;;  %s412_s13 = int_to_ptr.vmem [resolvable:$true] %s411_s13 }
  0x2e   :  { %182 = vmatpush1.bf16.msra.mxu0 %v494_v4  ;;  %459 = vmatpush3.bf16.msra.mxu1 %v515_v12  ;;  %v507_v18 = vld [vmem:[#allocation5 + $0x14] ss:$8 sps:$4 sm:$0xff]   ;;  %v519_v19 = vld [vmem:[#allocation7 + $0x28] sm:$0xff]   ;;  %v520_v20 = vld [vmem:[#allocation7 + $0x60] sm:$0xff]   ;;  %v89_v36 = vsub.s32 1, %v84_v35  ;;  %v85_v37 = vsub.s32 0, %v84_v35  ;;  %p595_p2 = scmp.lt.s32.totalorder %s412_s13, %s412_s13 }
  0x2f   :  { %183 = vmatprep.subr.bf16.mxu0 %v495_v5  ;;  %460 = vmatprep.subr.bf16.mxu1 %v516_v14  ;;  %v509_v21 = vld [vmem:[#allocation5 + $0x10] ss:$8 sps:$4 sm:$0xff]   ;;  %v521_v22 = vld [vmem:[#allocation7 + $0x20] sm:$0xff]   ;;  %v526_v30 = vld [vmem:[#allocation7 + $0x48] sm:$0xff]   ;;  %s590_s14 = scalar_lea.vmem %s412_s13, 256 }
  0x30   :  { %v510_v23 = vld [vmem:[#allocation5 + $0x4] ss:$8 sps:$4 sm:$0xff]   ;;  %v522_v24 = vld [vmem:[#allocation7 + $0x58] sm:$0xff]   ;;  %v512_v25 = vld [vmem:[#allocation5] ss:$8 sps:$4 sm:$0xff]   ;;  %p591_p1 = scmp.ne.s32.totalorder %s412_s13, %s590_s14  ;;  %p596_p3 = scmp.lt.s32.totalorder %s590_s14, %s590_s14 }
  0x31   :  { %v523_v26 = vld [vmem:[#allocation7 + $0x18] sm:$0xff]   ;;  %v524_v28 = vld [vmem:[#allocation7 + $0x50] sm:$0xff]   ;;  %v527_v31 = vld [vmem:[#allocation7 + $0x8] sm:$0xff]  }
  0x32   :  { %184 = vmatpush1.bf16.msra.mxu0 %v497_v6  ;;  %461 = vmatpush3.bf16.msra.mxu1 %v517_v15  ;;  %v513_v27 = vld [vmem:[#allocation2] sm:$0xff]   ;;  %v525_v29 = vld [vmem:[#allocation7 + $0x10] sm:$0xff]   ;;  %v528_v32 = vld [vmem:[#allocation7 + $0x40] sm:$0xff]   ;;  %p597_p4 = por %p596_p3, %p595_p2 }
  0x33   :  { %185 = vmatprep.subr.bf16.mxu0 %v498_v7  ;;  %462 = vmatprep.subr.bf16.mxu1 %v518_v16  ;;  %v529_v33 = vld [vmem:[#allocation7] sm:$0xff]   ;;  %v81_v38 = vld [vmem:[%s681_s2] sm:$0x3] }
  0x34   :  { %v90_v40 = vrot.slane %v81_v38, %v89_v36  ;;  %v86_v41 = vrot.slane %v81_v38, %v85_v37  ;;  %v441_v56 = vld [vmem:[%s683_s4] ss:$0 sm:$0xff]  ;;  %p598_p5 = pnand %p597_p4, %p591_p1 }
  0x36   :  { %186 = vmatpush1.bf16.msra.mxu0 %v500_v8  ;;  %463 = vmatpush3.bf16.msra.mxu1 %v519_v19 }
  0x37   :  { %187 = vmatprep.subr.bf16.mxu0 %v501_v9  ;;  %464 = vmatprep.subr.bf16.mxu1 %v520_v20 }
  0x3a   :  { %188 = vmatpush1.bf16.msra.mxu0 %v503_v11  ;;  %465 = vmatpush3.bf16.msra.mxu1 %v521_v22 }
  0x3b   :  { %189 = vmatprep.subr.bf16.mxu0 %v504_v13  ;;  %466 = vmatprep.subr.bf16.mxu1 %v522_v24 }
  0x3e   :  { %190 = vmatpush1.bf16.msra.mxu0 %v506_v17  ;;  %467 = vmatpush3.bf16.msra.mxu1 %v523_v26 }
  0x3f   :  { %191 = vmatprep.subr.bf16.mxu0 %v507_v18  ;;  %468 = vmatprep.subr.bf16.mxu1 %v524_v28 }
  0x42   :  { %192 = vmatpush1.bf16.msra.mxu0 %v509_v21  ;;  %469 = vmatpush3.bf16.msra.mxu1 %v525_v29 }
  0x43   :  { %193 = vmatprep.subr.bf16.mxu0 %v510_v23  ;;  %470 = vmatprep.subr.bf16.mxu1 %v526_v30 }
  0x46   :  { %194 = vmatpush1.bf16.msra.mxu0 %v512_v25  ;;  %471 = vmatpush3.bf16.msra.mxu1 %v527_v31 }
  0x47   :  { %472 = vmatprep.subr.bf16.mxu1 %v528_v32 }
  0x49   :  { %212 = vmatmul.mubr.bf16.vlgmr.msra.gmra.mxu0 %v513_v27 }
  0x4a   :  { %473 = vmatpush3.bf16.msra.mxu1 %v529_v33 }
 0x109   :  { %v213_v39 = vpop.f32.mrf.mxu0 }
 0x10a   :  { %v214_v46 = vadd.f32 %v213_v39, %v86_v41 }
 0x10b   :  { %v215_v42 = vpop.f32.mrf.mxu0 }
 0x10c   :  { %v216_v44 = vadd.f32 %v215_v42, %v90_v40  ;;  %v222_v52 = vmax.f32 %v214_v46, 0.0 }
 0x10d   :  { %v217_v43 = vpop.f32.mrf.mxu0 }
 0x10e   :  { %v218_v45 = vadd.f32 %v217_v43, %v86_v41  ;;  %v223_v50 = vmax.f32 %v216_v44, 0.0 }
 0x10f   :  { %v219_v47 = vpop.f32.mrf.mxu0 }
 0x110   :  { %v220_v48 = vadd.f32 %v219_v47, %v90_v40  ;;  %v224_v49 = vmax.f32 %v218_v45, 0.0 }
 0x112   :  { %v225_v51 = vmax.f32 %v220_v48, 0.0  ;;  %v226_v54 = vpack.c.bf16 %v224_v49, %v222_v52 }
 0x114   :  { %v227_v53 = vpack.c.bf16 %v225_v51, %v223_v50 }
 0x116   :  { %395 = vmatprep.mubr.bf16.mxu1 %v227_v53 }
 0x117   :  { %396 = vmatmul.mubr.bf16.vlgmr.msra.gmra.mxu1 %v226_v54 }
 0x1d7   :  { %v474_v55 = vpop.f32.mrf.mxu1 }
 0x1d9   :  { %v475_v57 = vpop.f32.mrf.mxu1 }
 0x1da   :  { %v476_v58 = vadd.f32 %v475_v57, %v474_v55 }
 0x1db   :  { %v477_v59 = vpop.f32.mrf.mxu1 }
 0x1dc   :  { %v398_v60 = vadd.f32 %v476_v58, %v441_v56 }
 0x1dd   :  { %v478_v61 = vpop.f32.mrf.mxu1 }
 0x1de   :  { %404 = vst [vmem:[#allocation8] sm:$0xff] %v398_v60  ;;  %v479_v62 = vadd.f32 %v478_v61, %v477_v59 }
 0x1e0   :  { %v401_v63 = vadd.f32 %v479_v62, %v441_v56 }
 0x1e2   :  { %405 = vst [vmem:[#allocation8 + $0x8] sm:$0xff] %v401_v63 }
 0x1e3   :  { %601 = shalt.err (!%p598_p5)
}
 0x1e4   :  { %417 = dma.vmem_to_hbm [thread:$0]  %s412_s13, 256, %s684_s5, [#allocation4], %s617_s21, %s617_s21, %s618_s22  }
 0x1e5   :  { %614 = dma.done.wait [#allocation4], 256  }
 0x1e6   :  { %615 = vsyncadd [#allocation4], 4294967040 }
 0x1e7   :  { %421 = vsyncpa [#allocation3], 1 }
 0x1e8   :  { %422 = vsyncpa [#allocation6], 1 }
 0x1e9   :  { %423 = vsyncpa [#allocation4], 1 }

</bundles_post_ra>
